<compile_context>
chip_gen: v5e
topology: v5e:2x2
jax: 0.10.0
libtpu: 0.0.40
codegen_flags: <defaults>
</compile_context>

<pallas_src>
import functools

import jax
import jax.numpy as jnp
from jax.experimental import pallas as pl
from jax.experimental.pallas import tpu as pltpu

M = 100            # m
DIM_X = 1          # dim_x
DIN = M + DIM_X    # 101 input features
HID = 100          # hidden width

HID_P = 128        # hidden dim padded to a full lane
OUT_W = 8          # fused-head output width (col 0 = pred, col 1 = var)


def mlp_unc_kernel(x_ref, w1_ref, b1_ref, w2_ref, b2_ref, wh_ref, bh_ref,
                   out_ref, *, compute_dtype):
    cd = compute_dtype
    x = x_ref[...].astype(cd)                                     # [TB, DIN]
    h1 = jnp.dot(x, w1_ref[...].astype(cd),
                 preferred_element_type=jnp.float32) + b1_ref[...]
    h1 = jnp.maximum(h1, 0.0)                                     # [TB, HID_P]
    h2 = jnp.dot(h1.astype(cd), w2_ref[...].astype(cd),
                 preferred_element_type=jnp.float32) + b2_ref[...]
    h2 = jnp.maximum(h2, 0.0)                                     # [TB, HID_P]
    out_ref[...] = (jnp.dot(h2.astype(cd), wh_ref[...].astype(cd),
                            preferred_element_type=jnp.float32)
                    + bh_ref[...])                                # [TB, OUT_W]


def prepare_params(params):
    """One-time zero-padding + head fusion (hoisted out of the per-call path).

    Weights are stored [in, out] (transposed vs. PyTorch's [out, in])."""
    w1, b1, w2, b2, wp, bp, wv, bv = params
    f32 = jnp.float32
    w1_p = jnp.zeros((DIN, HID_P), f32).at[:, :HID].set(w1)
    b1_p = jnp.zeros((1, HID_P), f32).at[:, :HID].set(b1)
    w2_p = jnp.zeros((HID_P, HID_P), f32).at[:HID, :HID].set(w2)
    b2_p = jnp.zeros((1, HID_P), f32).at[:, :HID].set(b2)
    # Fused regression heads: column 0 = pred, column 1 = var, rest zero.
    wh_p = (jnp.zeros((HID_P, OUT_W), f32)
            .at[:HID, 0].set(wp[:, 0])
            .at[:HID, 1].set(wv[:, 0]))
    bh_p = jnp.zeros((1, OUT_W), f32).at[0, 0].set(bp[0]).at[0, 1].set(bv[0])
    return (w1_p, b1_p, w2_p, b2_p, wh_p, bh_p)


def _pick_batch_tile(B, block_b):
    """Sublane-aligned batch tile; guarantees >= 2 grid steps when B > 8."""
    if B <= 8:
        return B                                  # single full-extent tile
    half = ((-(-B // 2)) + 7) // 8 * 8            # ceil(B/2), rounded up to 8
    block_b = max(8, (block_b // 8) * 8)
    return min(block_b, half)


def mlp_unc_forward(x, prepared, *, block_b=4096, compute_dtype=jnp.bfloat16):
    """x: [B, DIN] float32. Returns (pred [B,1], var [B,1]) in float32."""
    B = x.shape[0]
    w1_p, b1_p, w2_p, b2_p, wh_p, bh_p = prepared

    tb = _pick_batch_tile(B, block_b)
    grid = (pl.cdiv(B, tb),)          # ragged final block is masked by Pallas
    resident = lambda shape: pl.BlockSpec(shape, lambda i: (0, 0))

    kernel = functools.partial(mlp_unc_kernel, compute_dtype=compute_dtype)
    out = pl.pallas_call(
        kernel,
        out_shape=jax.ShapeDtypeStruct((B, OUT_W), jnp.float32),
        grid_spec=pltpu.PrefetchScalarGridSpec(
            num_scalar_prefetch=0,
            grid=grid,
            in_specs=[pl.BlockSpec((tb, DIN), lambda i: (i, 0)),   # x tile
                      resident((DIN, HID_P)), resident((1, HID_P)),
                      resident((HID_P, HID_P)), resident((1, HID_P)),
                      resident((HID_P, OUT_W)), resident((1, OUT_W))],
            out_specs=pl.BlockSpec((tb, OUT_W), lambda i: (i, 0)),
        ),
        compiler_params=pltpu.CompilerParams(
            dimension_semantics=("parallel",)),
    )(x, w1_p, b1_p, w2_p, b2_p, wh_p, bh_p)

    pred = out[:, 0:1]
    var = out[:, 1:2]
    return pred, var


def init_params(key):
    """Matches MLP_unc.init_weights: Linear weights ~ N(0, 0.001), biases = 0.
    Weights stored [in, out]."""
    k1, k2, k3, k4 = jax.random.split(key, 4)
    std = 0.001
    w1 = std * jax.random.normal(k1, (DIN, HID), jnp.float32)
    b1 = jnp.zeros((1, HID), jnp.float32)
    w2 = std * jax.random.normal(k2, (HID, HID), jnp.float32)
    b2 = jnp.zeros((1, HID), jnp.float32)
    wp = std * jax.random.normal(k3, (HID, 1), jnp.float32)
    bp = jnp.zeros((1,), jnp.float32)
    wv = std * jax.random.normal(k4, (HID, 1), jnp.float32)
    bv = jnp.zeros((1,), jnp.float32)
    return (w1, b1, w2, b2, wp, bp, wv, bv)


def reference_forward(x, params):
    w1, b1, w2, b2, wp, bp, wv, bv = params
    h = jnp.maximum(x @ w1 + b1, 0.0)
    h = jnp.maximum(h @ w2 + b2, 0.0)
    return h @ wp + bp.reshape(1, 1), h @ wv + bv.reshape(1, 1)


if __name__ == "__main__":
    key = jax.random.PRNGKey(0)
    kx, kp, kx2 = jax.random.split(key, 3)
    params = init_params(kp)
    prepared = prepare_params(params)

    # Small batch: single full-extent tile, exact f32 compute path.
    B = 8
    x = jax.random.normal(kx, (B, DIN), jnp.float32)
    pred, var = mlp_unc_forward(x, prepared, compute_dtype=jnp.float32)
    jax.block_until_ready((pred, var))
    pred_ref, var_ref = reference_forward(x, params)
    assert pred.shape == (B, 1) and var.shape == (B, 1)
    assert jnp.allclose(pred, pred_ref, atol=1e-5, rtol=1e-5)
    assert jnp.allclose(var, var_ref, atol=1e-5, rtol=1e-5)

    # Default bf16-MXU path on the same batch (f32 accumulation; looser tol).
    pred_bf, var_bf = mlp_unc_forward(x, prepared)
    jax.block_until_ready((pred_bf, var_bf))
    assert jnp.allclose(pred_bf, pred_ref, atol=1e-6, rtol=5e-2)
    assert jnp.allclose(var_bf, var_ref, atol=1e-6, rtol=5e-2)

    # Larger batch: multi-tile grid with a ragged final block (no jnp.pad).
    B2 = 272
    x2 = jax.random.normal(kx2, (B2, DIN), jnp.float32)
    pred2, var2 = mlp_unc_forward(x2, prepared, block_b=128,
                                  compute_dtype=jnp.float32)
    jax.block_until_ready((pred2, var2))
    pred2_ref, var2_ref = reference_forward(x2, params)
    assert pred2.shape == (B2, 1) and var2.shape == (B2, 1)
    assert jnp.allclose(pred2, pred2_ref, atol=1e-5, rtol=1e-5)
    assert jnp.allclose(var2, var2_ref, atol=1e-5, rtol=1e-5)

    print("KERNEL_OK")
</pallas_src>

<mosaic_0001>
module attributes {stable_mosaic.version = 11 : i64} {
  func.func @mlp_unc_kernel(%arg0: i32, %arg1: memref<8x101xf32, #tpu.memory_space<vmem>>, %arg2: memref<101x128xf32, #tpu.memory_space<vmem>>, %arg3: memref<1x128xf32, #tpu.memory_space<vmem>>, %arg4: memref<128x128xf32, #tpu.memory_space<vmem>>, %arg5: memref<1x128xf32, #tpu.memory_space<vmem>>, %arg6: memref<128x8xf32, #tpu.memory_space<vmem>>, %arg7: memref<1x8xf32, #tpu.memory_space<vmem>>, %arg8: memref<8x8xf32, #tpu.memory_space<vmem>>) attributes {dimension_semantics = [#tpu.dimension_semantics<parallel>], iteration_bounds = array<i64: 1>, scalar_prefetch = 0 : i64, scratch_operands = 0 : i64, tpu.core_type = #tpu.core_type<tc>, window_params = [{transform_indices = @transform_0, window_bounds = array<i64: 8, 101>}, {pipeline_mode = #tpu.pipeline_mode<synchronous>, transform_indices = @transform_1, window_bounds = array<i64: 101, 128>}, {pipeline_mode = #tpu.pipeline_mode<synchronous>, transform_indices = @transform_2, window_bounds = array<i64: 1, 128>}, {pipeline_mode = #tpu.pipeline_mode<synchronous>, transform_indices = @transform_3, window_bounds = array<i64: 128, 128>}, {pipeline_mode = #tpu.pipeline_mode<synchronous>, transform_indices = @transform_4, window_bounds = array<i64: 1, 128>}, {pipeline_mode = #tpu.pipeline_mode<synchronous>, transform_indices = @transform_5, window_bounds = array<i64: 128, 8>}, {pipeline_mode = #tpu.pipeline_mode<synchronous>, transform_indices = @transform_6, window_bounds = array<i64: 1, 8>}, {transform_indices = @transform_7, window_bounds = array<i64: 8, 8>}]} {
    %c0 = arith.constant 0 : index
    %c0_0 = arith.constant 0 : index
    %0 = vector.load %arg1[%c0, %c0_0] : memref<8x101xf32, #tpu.memory_space<vmem>>, vector<8x101xf32>
    %c0_1 = arith.constant 0 : index
    %c0_2 = arith.constant 0 : index
    %1 = vector.load %arg2[%c0_1, %c0_2] : memref<101x128xf32, #tpu.memory_space<vmem>>, vector<101x128xf32>
    %cst = arith.constant dense<0.000000e+00> : vector<8x128xf32>
    %2 = tpu.matmul %0, %1, %cst {dimension_numbers = #tpu.dot_dimension_numbers<[1], [0], [0], [1], [0, 0, 1, 1], [], []>} : vector<8x101xf32>, vector<101x128xf32>, vector<8x128xf32> -> vector<8x128xf32>
    %c0_3 = arith.constant 0 : index
    %c0_4 = arith.constant 0 : index
    %3 = vector.load %arg3[%c0_3, %c0_4] : memref<1x128xf32, #tpu.memory_space<vmem>>, vector<1x128xf32>
    %4 = vector.broadcast %3 : vector<1x128xf32> to vector<8x128xf32>
    %5 = arith.addf %2, %4 : vector<8x128xf32>
    %cst_5 = arith.constant 0.000000e+00 : f32
    %6 = vector.broadcast %cst_5 : f32 to vector<8x128xf32>
    %7 = arith.maximumf %5, %6 : vector<8x128xf32>
    %c0_6 = arith.constant 0 : index
    %c0_7 = arith.constant 0 : index
    %8 = vector.load %arg4[%c0_6, %c0_7] : memref<128x128xf32, #tpu.memory_space<vmem>>, vector<128x128xf32>
    %cst_8 = arith.constant dense<0.000000e+00> : vector<8x128xf32>
    %9 = tpu.matmul %7, %8, %cst_8 {dimension_numbers = #tpu.dot_dimension_numbers<[1], [0], [0], [1], [0, 0, 1, 1], [], []>} : vector<8x128xf32>, vector<128x128xf32>, vector<8x128xf32> -> vector<8x128xf32>
    %c0_9 = arith.constant 0 : index
    %c0_10 = arith.constant 0 : index
    %10 = vector.load %arg5[%c0_9, %c0_10] : memref<1x128xf32, #tpu.memory_space<vmem>>, vector<1x128xf32>
    %11 = vector.broadcast %10 : vector<1x128xf32> to vector<8x128xf32>
    %12 = arith.addf %9, %11 : vector<8x128xf32>
    %cst_11 = arith.constant 0.000000e+00 : f32
    %13 = vector.broadcast %cst_11 : f32 to vector<8x128xf32>
    %14 = arith.maximumf %12, %13 : vector<8x128xf32>
    %c0_12 = arith.constant 0 : index
    %c0_13 = arith.constant 0 : index
    %15 = vector.load %arg6[%c0_12, %c0_13] : memref<128x8xf32, #tpu.memory_space<vmem>>, vector<128x8xf32>
    %cst_14 = arith.constant dense<0.000000e+00> : vector<8x8xf32>
    %16 = tpu.matmul %14, %15, %cst_14 {dimension_numbers = #tpu.dot_dimension_numbers<[1], [0], [0], [1], [0, 0, 1, 1], [], []>} : vector<8x128xf32>, vector<128x8xf32>, vector<8x8xf32> -> vector<8x8xf32>
    %c0_15 = arith.constant 0 : index
    %c0_16 = arith.constant 0 : index
    %17 = vector.load %arg7[%c0_15, %c0_16] : memref<1x8xf32, #tpu.memory_space<vmem>>, vector<1x8xf32>
    %18 = vector.broadcast %17 : vector<1x8xf32> to vector<8x8xf32>
    %19 = arith.addf %16, %18 : vector<8x8xf32>
    %c0_17 = arith.constant 0 : index
    %c0_18 = arith.constant 0 : index
    %20 = vector.load %arg8[%c0_17, %c0_18] : memref<8x8xf32, #tpu.memory_space<vmem>>, vector<8x8xf32>
    tpu.vector_store %arg8[%c0_17, %c0_18], %19 {strides = array<i32>} : memref<8x8xf32, #tpu.memory_space<vmem>>, vector<8x8xf32>,
    return
  }
  func.func @transform_0(%arg0: i32) -> (i32, i32) {
    %c0_i32 = arith.constant 0 : i32
    %c0_i32_0 = arith.constant 0 : i32
    return %arg0, %c0_i32 : i32, i32
  }
  func.func @transform_1(%arg0: i32) -> (i32, i32) {
    %c0_i32 = arith.constant 0 : i32
    %c0_i32_0 = arith.constant 0 : i32
    %c0_i32_1 = arith.constant 0 : i32
    return %c0_i32, %c0_i32_0 : i32, i32
  }
  func.func @transform_2(%arg0: i32) -> (i32, i32) {
    %c0_i32 = arith.constant 0 : i32
    %c0_i32_0 = arith.constant 0 : i32
    %c0_i32_1 = arith.constant 0 : i32
    return %c0_i32, %c0_i32_0 : i32, i32
  }
  func.func @transform_3(%arg0: i32) -> (i32, i32) {
    %c0_i32 = arith.constant 0 : i32
    %c0_i32_0 = arith.constant 0 : i32
    %c0_i32_1 = arith.constant 0 : i32
    return %c0_i32, %c0_i32_0 : i32, i32
  }
  func.func @transform_4(%arg0: i32) -> (i32, i32) {
    %c0_i32 = arith.constant 0 : i32
    %c0_i32_0 = arith.constant 0 : i32
    %c0_i32_1 = arith.constant 0 : i32
    return %c0_i32, %c0_i32_0 : i32, i32
  }
  func.func @transform_5(%arg0: i32) -> (i32, i32) {
    %c0_i32 = arith.constant 0 : i32
    %c0_i32_0 = arith.constant 0 : i32
    %c0_i32_1 = arith.constant 0 : i32
    return %c0_i32, %c0_i32_0 : i32, i32
  }
  func.func @transform_6(%arg0: i32) -> (i32, i32) {
    %c0_i32 = arith.constant 0 : i32
    %c0_i32_0 = arith.constant 0 : i32
    %c0_i32_1 = arith.constant 0 : i32
    return %c0_i32, %c0_i32_0 : i32, i32
  }
  func.func @transform_7(%arg0: i32) -> (i32, i32) {
    %c0_i32 = arith.constant 0 : i32
    %c0_i32_0 = arith.constant 0 : i32
    return %arg0, %c0_i32 : i32, i32
  }
}

</mosaic_0001>

<bundles_post_ra>
// kernel: tpu_custom_call.1
= control target key start
LH: loop header
LB: loop body
LE: loop exit
PB: predicated region body
PF: predicated region fallthrough
CT: control target
= control target key end

     0   :  { %12 = vsyncpa [#allocation3], 0  ;;  %s409_s0 = inlined_call_operand.vmem [shape: f32[8,101], index: 0, kind: input, shape index: {}]   ;;  %s410_s1 = inlined_call_operand.hbm [shape: f32[101,128], index: 1, kind: input, shape index: {}]   ;;  %s411_s2 = inlined_call_operand.vmem [shape: f32[1,128], index: 2, kind: input, shape index: {}]   ;;  %s412_s3 = inlined_call_operand.vmem [shape: f32[128,128], index: 3, kind: input, shape index: {}]   ;;  %s413_s4 = inlined_call_operand.vmem [shape: f32[1,128], index: 4, kind: input, shape index: {}]   ;;  %s414_s5 = inlined_call_operand.vmem [shape: f32[128,8], index: 5, kind: input, shape index: {}]   ;;  %s415_s6 = inlined_call_operand.vmem [shape: f32[1,8], index: 6, kind: input, shape index: {}]   ;;  %s416_s7 = inlined_call_operand.hbm [shape: f32[8,8], index: 7, kind: output, shape index: {}]  }
   0x1   :  { %13 = vsyncpa [#allocation4], 0  ;;  %s20_s26 = sshll.u32 %s410_s1, 4  ;;  %s251_s27 = smov [#allocation2]   ;;  %s21_s26 = int_to_ptr.hbm [resolvable:$true] %s20_s26 }
   0x2   :  { %s22_s28 = sshll.u32 %s251_s27, 4  ;;  %s252_s29 = smov 128   ;;  %s23_s28 = int_to_ptr.vmem [resolvable:$true] %s22_s28 }
   0x3   :  { %s253_s30 = smov 8  }
   0x4   :  { %28 = dma.hbm_to_vmem [thread:$0]  %s21_s26, 1664, %s23_s28, [#allocation3], %s252_s29, %s252_s29, %s253_s30  }
   0x5   :  { %247 = dma.done.wait [#allocation3], 1664  }
   0x6   :  { %248 = vsyncadd [#allocation3], 4294965632  ;;  %vm65_vm0 = vcmask 1044480   ;;  %v56_v0 = vld [vmem:[#allocation2 + $0x60] sm:$0x1f]  ;;  %v55_v1 = vld [vmem:[#allocation2 + $0x58] sm:$0xff] }
   0x7   :  { %190 = vmatpush.msk.msra.mxu0 %vm65_vm0, %v56_v0  ;;  %v54_v2 = vld [vmem:[#allocation2 + $0x50] sm:$0xff]  ;;  %v53_v3 = vld [vmem:[#allocation2 + $0x48] sm:$0xff]  ;;  %v105_v4 = vld [vmem:[%s412_s3 + $0x78] sm:$0xff]  ;;  %vm61_vm1 = vcmask 826368   ;;  %s254_s26 = smov [#allocation5]   ;;  %s180_s30 = sshll.u32 %s416_s7, 4  ;;  %s181_s30 = int_to_ptr.hbm [resolvable:$true] %s180_s30 }
   0x8   :  { %110 = vmatpush.msra.mxu1 %v105_v4  ;;  %v104_v5 = vld [vmem:[%s412_s3 + $0x70] sm:$0xff]  ;;  %v52_v6 = vld [vmem:[#allocation2 + $0x40] sm:$0xff]  ;;  %v103_v7 = vld [vmem:[%s412_s3 + $0x68] sm:$0xff]  ;;  %s178_s27 = sshll.u32 %s254_s26, 4  ;;  %vm171_vm2 = vcmask 64512   ;;  %s179_s27 = int_to_ptr.vmem [resolvable:$true] %s178_s27 }
   0x9   :  { %73 = vmatpush.msra.mxu0 %v55_v1  ;;  %v51_v8 = vld [vmem:[#allocation2 + $0x38] sm:$0xff]  ;;  %v102_v9 = vld [vmem:[%s412_s3 + $0x60] sm:$0xff]  ;;  %v50_v10 = vld [vmem:[#allocation2 + $0x30] sm:$0xff] }
   0xa   :  { %111 = vmatpush.msra.mxu1 %v104_v5  ;;  %v101_v11 = vld [vmem:[%s412_s3 + $0x58] sm:$0xff]  ;;  %v49_v12 = vld [vmem:[#allocation2 + $0x28] sm:$0xff]  ;;  %v100_v13 = vld [vmem:[%s412_s3 + $0x50] sm:$0xff] }
   0xb   :  { %74 = vmatpush.msra.mxu0 %v54_v2  ;;  %v48_v14 = vld [vmem:[#allocation2 + $0x20] sm:$0xff]  ;;  %v99_v15 = vld [vmem:[%s412_s3 + $0x48] sm:$0xff]  ;;  %v47_v16 = vld [vmem:[#allocation2 + $0x18] sm:$0xff] }
   0xc   :  { %112 = vmatpush.msra.mxu1 %v103_v7  ;;  %v98_v17 = vld [vmem:[%s412_s3 + $0x40] sm:$0xff]  ;;  %v46_v18 = vld [vmem:[#allocation2 + $0x10] sm:$0xff]  ;;  %v97_v19 = vld [vmem:[%s412_s3 + $0x38] sm:$0xff] }
   0xd   :  { %75 = vmatpush.msra.mxu0 %v53_v3  ;;  %v45_v20 = vld [vmem:[#allocation2 + $0x8] sm:$0xff]  ;;  %v96_v21 = vld [vmem:[%s412_s3 + $0x30] sm:$0xff]  ;;  %v44_v22 = vld [vmem:[#allocation2] sm:$0xff] }
   0xe   :  { %113 = vmatpush.msra.mxu1 %v102_v9  ;;  %v95_v23 = vld [vmem:[%s412_s3 + $0x28] sm:$0xff]  ;;  %v43_v24 = vld [vmem:[%s409_s0] sm:$0xff]  ;;  %v93_v26 = vld [vmem:[%s412_s3 + $0x18] sm:$0xff] }
   0xf   :  { %76 = vmatpush.msra.mxu0 %v52_v6  ;;  %v94_v25 = vld [vmem:[%s412_s3 + $0x20] sm:$0xff]  ;;  %v92_v27 = vld [vmem:[%s412_s3 + $0x10] sm:$0xff]  ;;  %v91_v28 = vld [vmem:[%s412_s3 + $0x8] sm:$0xff] }
  0x10   :  { %114 = vmatpush.msra.mxu1 %v101_v11  ;;  %v90_v29 = vld [vmem:[%s412_s3] sm:$0xff]  ;;  %v146_v30 = vld [vmem:[%s414_s5 + $0x78] sm:$0xff]  ;;  %v145_v31 = vld [vmem:[%s414_s5 + $0x70] sm:$0xff] }
  0x11   :  { %77 = vmatpush.msra.mxu0 %v51_v8  ;;  %151 = vmatpush.msra.mxu2 %v146_v30  ;;  %v144_v32 = vld [vmem:[%s414_s5 + $0x68] sm:$0xff]  ;;  %v143_v33 = vld [vmem:[%s414_s5 + $0x60] sm:$0xff]  ;;  %v142_v34 = vld [vmem:[%s414_s5 + $0x58] sm:$0xff] }
  0x12   :  { %115 = vmatpush.msra.mxu1 %v100_v13  ;;  %v141_v35 = vld [vmem:[%s414_s5 + $0x50] sm:$0xff]  ;;  %v140_v36 = vld [vmem:[%s414_s5 + $0x48] sm:$0xff]  ;;  %v139_v37 = vld [vmem:[%s414_s5 + $0x40] sm:$0xff] }
  0x13   :  { %78 = vmatpush.msra.mxu0 %v50_v10  ;;  %152 = vmatpush.msra.mxu2 %v145_v31  ;;  %v138_v38 = vld [vmem:[%s414_s5 + $0x38] sm:$0xff]  ;;  %v137_v39 = vld [vmem:[%s414_s5 + $0x30] sm:$0xff]  ;;  %v136_v40 = vld [vmem:[%s414_s5 + $0x28] sm:$0xff] }
  0x14   :  { %116 = vmatpush.msra.mxu1 %v99_v15  ;;  %v135_v41 = vld [vmem:[%s414_s5 + $0x20] sm:$0xff]  ;;  %v134_v42 = vld [vmem:[%s414_s5 + $0x18] sm:$0xff]  ;;  %v133_v47 = vld [vmem:[%s414_s5 + $0x10] sm:$0xff] }
  0x15   :  { %79 = vmatpush.msra.mxu0 %v49_v12  ;;  %153 = vmatpush.msra.mxu2 %v144_v32  ;;  %v196_v43 = vld [vmem:[%s411_s2] ss:$0 sm:$0xff]  ;;  %v132_v48 = vld [vmem:[%s414_s5 + $0x8] sm:$0xff] }
  0x16   :  { %117 = vmatpush.msra.mxu1 %v98_v17  ;;  %v131_v49 = vld [vmem:[%s414_s5] sm:$0xff] }
  0x17   :  { %80 = vmatpush.msra.mxu0 %v48_v14  ;;  %154 = vmatpush.msra.mxu2 %v143_v33  ;;  %v197_v50 = vld [vmem:[%s413_s4] ss:$0 sm:$0xff] }
  0x18   :  { %118 = vmatpush.msra.mxu1 %v97_v19  ;;  %v198_v54 = vld [vmem:[%s415_s6] ss:$0 sm:$0xff] }
  0x19   :  { %81 = vmatpush.msra.mxu0 %v47_v16  ;;  %155 = vmatpush.msra.mxu2 %v142_v34 }
  0x1a   :  { %119 = vmatpush.msra.mxu1 %v96_v21 }
  0x1b   :  { %82 = vmatpush.msra.mxu0 %v46_v18  ;;  %156 = vmatpush.msra.mxu2 %v141_v35 }
  0x1c   :  { %120 = vmatpush.msra.mxu1 %v95_v23 }
  0x1d   :  { %83 = vmatpush.msra.mxu0 %v45_v20  ;;  %157 = vmatpush.msra.mxu2 %v140_v36 }
  0x1e   :  { %121 = vmatpush.msra.mxu1 %v94_v25 }
  0x1f   :  { %84 = vmatpush.msra.mxu0 %v44_v22  ;;  %158 = vmatpush.msra.mxu2 %v139_v37 }
  0x20   :  { %191 = vmatmul.msk.f32.vlgmr.msra.gmra.mxu0 %vm61_vm1, %v43_v24  ;;  %122 = vmatpush.msra.mxu1 %v93_v26 }
  0x21   :  { %159 = vmatpush.msra.mxu2 %v138_v38 }
  0x22   :  { %123 = vmatpush.msra.mxu1 %v92_v27 }
  0x23   :  { %160 = vmatpush.msra.mxu2 %v137_v39 }
  0x24   :  { %124 = vmatpush.msra.mxu1 %v91_v28 }
  0x25   :  { %161 = vmatpush.msra.mxu2 %v136_v40 }
  0x26   :  { %125 = vmatpush.msra.mxu1 %v90_v29 }
  0x27   :  { %162 = vmatpush.msra.mxu2 %v135_v41 }
  0x29   :  { %163 = vmatpush.msra.mxu2 %v134_v42 }
  0x2b   :  { %164 = vmatpush.msra.mxu2 %v133_v47 }
  0x2d   :  { %165 = vmatpush.msra.mxu2 %v132_v48 }
  0x2f   :  { %166 = vmatpush.msra.mxu2 %v131_v49 }
  0x9d   :  { %v86_v44 = vpop.f32.mrf.mxu0 }
  0x9e   :  { %v87_v45 = vadd.f32 %v196_v43, %v86_v44 }
  0xa0   :  { %v89_v46 = vmax.f32 %v87_v45, 0.0 }
  0xa2   :  { %126 = vmatmul.f32.vlgmr.msra.gmra.mxu1 %v89_v46 }
 0x11f   :  { %v127_v51 = vpop.f32.mrf.mxu1 }
 0x120   :  { %v128_v52 = vadd.f32 %v197_v50, %v127_v51 }
 0x122   :  { %v130_v53 = vmax.f32 %v128_v52, 0.0 }
 0x124   :  { %167 = vmatmul.f32.vlgmr.msra.gmra.mxu2 %v130_v53 }
 0x1a7   :  { %v168_v55 = vpop.f32.mrf.mxu2 }
 0x1a8   :  { %v169_v56 = vadd.f32 %v198_v54, %v168_v55 }
 0x1aa   :  { %172 = vst.msk [vmem:[#allocation5] sm:$0xff] %vm171_vm2, %v169_v56 }
 0x1ab   :  { %183 = dma.vmem_to_hbm [thread:$0]  %s179_s27, 128, %s181_s30, [#allocation4]  }
 0x1ac   :  { %249 = dma.done.wait [#allocation4], 128  }
 0x1ad   :  { %250 = vsyncadd [#allocation4], 4294967168 }
 0x1ae   :  { %188 = vsyncpa [#allocation3], 1 }
 0x1af   :  { %189 = vsyncpa [#allocation4], 1 }

</bundles_post_ra>
